<compile_context>
chip_gen: v7x
topology: tpu7x:2x2x1
jax: 0.10.0
libtpu: 0.0.40
codegen_flags: <defaults>
</compile_context>

<pallas_src>
import functools

import jax
import jax.numpy as jnp
from jax.experimental import pallas as pl
from jax.experimental.pallas import tpu as pltpu


def _matmul_kernel_acc(x_ref, w_ref, o_ref, acc_ref):
    """3-D grid (i, j, k): accumulate over K in an f32 VMEM scratch."""
    @pl.when(pl.program_id(2) == 0)
    def _init():
        acc_ref[...] = jnp.zeros_like(acc_ref)

    acc_ref[...] += jnp.dot(
        x_ref[...], w_ref[...], preferred_element_type=jnp.float32
    )

    @pl.when(pl.program_id(2) == pl.num_programs(2) - 1)
    def _store():
        o_ref[...] = acc_ref[...].astype(o_ref.dtype)


def _matmul_kernel_single_k(x_ref, w_ref, o_ref):
    """2-D grid (i, j): whole K fits in one tile -> no scratch accumulator."""
    o_ref[...] = jnp.dot(
        x_ref[...], w_ref[...], preferred_element_type=jnp.float32
    ).astype(o_ref.dtype)


def _round_up(x, m):
    return ((x + m - 1) // m) * m


@functools.partial(jax.jit, static_argnames=("tm", "tn", "tk", "force_pallas"))
def orth_dense_linear(x, weight, *, tm=256, tn=256, tk=512, force_pallas=False):
    """y = x @ weight.T, matching F.linear(x, weight, None).

    x:      (..., num_features)
    weight: (num_classes, num_features)
    returns (..., num_classes)
    """
    *lead, num_features = x.shape
    num_classes, wf = weight.shape
    assert wf == num_features

    x2 = x.reshape(-1, num_features)
    m = x2.shape[0]

    # Tiny-problem fast path: kernel launch overhead dwarfs ~MFLOP matmuls.
    if not force_pallas and 2 * m * num_classes * num_features < (1 << 22):
        return jnp.dot(x2, weight.T).reshape(*lead, num_classes)

    # Pre-transpose the weight once (outside the grid loop) -> contraction is
    # on the last dim of x and first dim of w inside the kernel, no in-kernel
    # per-step transpose.
    w_t = weight.T  # (F, C)

    # Effective tile sizes: shrink toward the (rounded-up) problem dims while
    # keeping the (8, 128) layout constraints and a lane-dense (>=128) output.
    tm_e = min(tm, _round_up(m, 8))
    tn_e = min(tn, _round_up(num_classes, 128))
    tk_e = min(tk, _round_up(num_features, 128))

    m_p = _round_up(m, tm_e)
    c_p = _round_up(num_classes, tn_e)
    f_p = _round_up(num_features, tk_e)

    x_p = x2
    if (m_p, f_p) != (m, num_features):
        x_p = jnp.pad(x2, ((0, m_p - m), (0, f_p - num_features)))
    w_p = w_t
    if (f_p, c_p) != (num_features, num_classes):
        w_p = jnp.pad(w_t, ((0, f_p - num_features), (0, c_p - num_classes)))

    itemsize = jnp.dtype(x.dtype).itemsize
    cost = pl.CostEstimate(
        flops=2 * m_p * c_p * f_p,
        transcendentals=0,
        bytes_accessed=(m_p * f_p + f_p * c_p + m_p * c_p) * itemsize,
    )

    if f_p == tk_e:
        # Single K tile: no accumulator scratch, 2-D parallel grid.
        grid = (m_p // tm_e, c_p // tn_e)
        out_p = pl.pallas_call(
            _matmul_kernel_single_k,
            out_shape=jax.ShapeDtypeStruct((m_p, c_p), x.dtype),
            grid_spec=pltpu.PrefetchScalarGridSpec(
                num_scalar_prefetch=0,
                grid=grid,
                in_specs=[
                    pl.BlockSpec((tm_e, tk_e), lambda i, j: (i, 0)),
                    pl.BlockSpec((tk_e, tn_e), lambda i, j: (0, j)),
                ],
                out_specs=pl.BlockSpec((tm_e, tn_e), lambda i, j: (i, j)),
            ),
            compiler_params=pltpu.CompilerParams(
                dimension_semantics=("parallel", "parallel"),
            ),
            cost_estimate=cost,
        )(x_p, w_p)
    else:
        # Multi-tile K: accumulate in f32 VMEM scratch across the last grid dim.
        grid = (m_p // tm_e, c_p // tn_e, f_p // tk_e)
        out_p = pl.pallas_call(
            _matmul_kernel_acc,
            out_shape=jax.ShapeDtypeStruct((m_p, c_p), x.dtype),
            grid_spec=pltpu.PrefetchScalarGridSpec(
                num_scalar_prefetch=0,
                grid=grid,
                in_specs=[
                    pl.BlockSpec((tm_e, tk_e), lambda i, j, k: (i, k)),
                    pl.BlockSpec((tk_e, tn_e), lambda i, j, k: (k, j)),
                ],
                out_specs=pl.BlockSpec((tm_e, tn_e), lambda i, j, k: (i, j)),
                scratch_shapes=[pltpu.VMEM((tm_e, tn_e), jnp.float32)],
            ),
            compiler_params=pltpu.CompilerParams(
                dimension_semantics=("parallel", "parallel", "arbitrary"),
            ),
            cost_estimate=cost,
        )(x_p, w_p)

    return out_p[:m, :num_classes].reshape(*lead, num_classes)


def make_orth_base(key, num_features, num_classes, dtype=jnp.float32):
    """Deterministic stand-in for the orthogonal-parametrized Linear weight.

    Returns a (num_classes, num_features) matrix with orthonormal rows
    (requires num_classes <= num_features), matching the `base` buffer.
    """
    a = jax.random.normal(key, (num_features, num_classes), dtype=jnp.float32)
    q, _ = jnp.linalg.qr(a)          # (num_features, num_classes), orthonormal cols
    return q.T.astype(dtype)         # (num_classes, num_features), orthonormal rows


if __name__ == "__main__":
    key = jax.random.PRNGKey(0)
    kx1, kw1, kx2, kw2 = jax.random.split(key, 4)

    # --- Test 1: module-like demo shape (batch, seq, features) -> classes ---
    # Exercises the single-K-tile fast path.
    batch, seq = 2, 8
    num_features, num_classes = 32, 16
    x1 = jax.random.normal(kx1, (batch, seq, num_features), dtype=jnp.float32)
    base1 = make_orth_base(kw1, num_features, num_classes)

    y1 = orth_dense_linear(x1, base1, force_pallas=True)
    y1 = jax.block_until_ready(y1)
    y1_ref = jnp.einsum("bsf,cf->bsc", x1, base1)
    assert y1.shape == (batch, seq, num_classes)
    assert jnp.allclose(y1, y1_ref, atol=1e-5, rtol=1e-5)

    # --- Test 2: ragged dims exercising padding + multi-tile N/K accumulation ---
    b2, s2, f2, c2 = 4, 17, 200, 130
    x2 = jax.random.normal(kx2, (b2, s2, f2), dtype=jnp.float32)
    base2 = make_orth_base(kw2, f2, c2)

    y2 = orth_dense_linear(x2, base2, tm=256, tn=128, tk=128, force_pallas=True)
    y2 = jax.block_until_ready(y2)
    y2_ref = jnp.einsum("bsf,cf->bsc", x2, base2)
    assert y2.shape == (b2, s2, c2)
    assert jnp.allclose(y2, y2_ref, atol=1e-4, rtol=1e-4)

    print("KERNEL_OK")
</pallas_src>

<mosaic_0001>
module attributes {stable_mosaic.version = 11 : i64} {
  func.func @_matmul_kernel_single_k(%arg0: i32, %arg1: i32, %arg2: memref<16x128xf32, #tpu.memory_space<vmem>>, %arg3: memref<128x128xf32, #tpu.memory_space<vmem>>, %arg4: memref<16x128xf32, #tpu.memory_space<vmem>>) attributes {dimension_semantics = [#tpu.dimension_semantics<parallel>, #tpu.dimension_semantics<parallel>], iteration_bounds = array<i64: 1, 1>, scalar_prefetch = 0 : i64, scratch_operands = 0 : i64, tpu.core_type = #tpu.core_type<tc>, window_params = [{transform_indices = @transform_0, window_bounds = array<i64: 16, 128>}, {transform_indices = @transform_1, window_bounds = array<i64: 128, 128>}, {transform_indices = @transform_2, window_bounds = array<i64: 16, 128>}]} {
    %c0 = arith.constant 0 : index
    %c0_0 = arith.constant 0 : index
    %0 = vector.load %arg2[%c0, %c0_0] : memref<16x128xf32, #tpu.memory_space<vmem>>, vector<16x128xf32>
    %c0_1 = arith.constant 0 : index
    %c0_2 = arith.constant 0 : index
    %1 = vector.load %arg3[%c0_1, %c0_2] : memref<128x128xf32, #tpu.memory_space<vmem>>, vector<128x128xf32>
    %cst = arith.constant dense<0.000000e+00> : vector<16x128xf32>
    %2 = tpu.matmul %0, %1, %cst {dimension_numbers = #tpu.dot_dimension_numbers<[1], [0], [0], [1], [0, 0, 1, 1], [], []>} : vector<16x128xf32>, vector<128x128xf32>, vector<16x128xf32> -> vector<16x128xf32>
    %c0_3 = arith.constant 0 : index
    %c0_4 = arith.constant 0 : index
    %3 = vector.load %arg4[%c0_3, %c0_4] : memref<16x128xf32, #tpu.memory_space<vmem>>, vector<16x128xf32>
    tpu.vector_store %arg4[%c0_3, %c0_4], %2 {strides = array<i32>} : memref<16x128xf32, #tpu.memory_space<vmem>>, vector<16x128xf32>,
    return
  }
  func.func @transform_0(%arg0: i32, %arg1: i32) -> (i32, i32) {
    %c0_i32 = arith.constant 0 : i32
    %c0_i32_0 = arith.constant 0 : i32
    return %arg0, %c0_i32 : i32, i32
  }
  func.func @transform_1(%arg0: i32, %arg1: i32) -> (i32, i32) {
    %c0_i32 = arith.constant 0 : i32
    %c0_i32_0 = arith.constant 0 : i32
    return %c0_i32, %arg1 : i32, i32
  }
  func.func @transform_2(%arg0: i32, %arg1: i32) -> (i32, i32) {
    %c0_i32 = arith.constant 0 : i32
    return %arg0, %arg1 : i32, i32
  }
}

</mosaic_0001>

<bundles_post_ra>
// kernel: orth_dense_linear.1
= control target key start
LH: loop header
LB: loop body
LE: loop exit
PB: predicated region body
PF: predicated region fallthrough
CT: control target
= control target key end

     0   :  { %s270_s1 = inlined_call_operand.vmem [shape: f32[128,128], index: 1, kind: input, shape index: {}]   ;;  %s271_s0 = inlined_call_operand.vmem [shape: f32[16,128], index: 0, kind: input, shape index: {}]   ;;  %s272_s2 = inlined_call_operand.vmem [shape: f32[16,128], index: 2, kind: output, shape index: {}]  }
   0x1   :  { %v13_v0 = vld [vmem:[%s270_s1] sm:$0xff]  ;;  %v14_v1 = vld [vmem:[%s270_s1 + $0x8] sm:$0xff]  ;;  %v15_v2 = vld [vmem:[%s270_s1 + $0x10] sm:$0xff] }
   0x2   :  { %v163_v3 = vpack.c.bf16 %v14_v1, %v13_v0  ;;  %v16_v4 = vld [vmem:[%s270_s1 + $0x18] sm:$0xff]  ;;  %v17_v6 = vld [vmem:[%s270_s1 + $0x20] sm:$0xff]  ;;  %v18_v7 = vld [vmem:[%s270_s1 + $0x28] sm:$0xff] }
   0x3   :  { %v167_v5 = vpack.c.bf16 %v16_v4, %v15_v2  ;;  %v171_v8 = vpack.c.bf16 %v18_v7, %v17_v6  ;;  %v11_v9 = vld [vmem:[%s271_s0] sm:$0xff]  ;;  %v19_v10 = vld [vmem:[%s270_s1 + $0x30] sm:$0xff]  ;;  %v20_v11 = vld [vmem:[%s270_s1 + $0x38] sm:$0xff] }
   0x4   :  { %164 = vmatprep.subr.bf16.mxu0 %v163_v3  ;;  %160 = vmatprep.mubr.f32.mxu0 %v11_v9  ;;  %v175_v12 = vpack.c.bf16 %v20_v11, %v19_v10  ;;  %v21_v13 = vld [vmem:[%s270_s1 + $0x40] sm:$0xff]  ;;  %v22_v14 = vld [vmem:[%s270_s1 + $0x48] sm:$0xff]  ;;  %v23_v16 = vld [vmem:[%s270_s1 + $0x50] sm:$0xff] }
   0x5   :  { %166 = vmatpush3.bf16.msra.mxu0 %v163_v3  ;;  %v179_v15 = vpack.c.bf16 %v22_v14, %v21_v13  ;;  %v24_v17 = vld [vmem:[%s270_s1 + $0x58] sm:$0xff]  ;;  %v25_v19 = vld [vmem:[%s270_s1 + $0x60] sm:$0xff]  ;;  %v26_v20 = vld [vmem:[%s270_s1 + $0x68] sm:$0xff] }
   0x6   :  { %168 = vmatprep.subr.bf16.mxu0 %v167_v5  ;;  %v183_v18 = vpack.c.bf16 %v24_v17, %v23_v16  ;;  %v187_v21 = vpack.c.bf16 %v26_v20, %v25_v19  ;;  %v27_v22 = vld [vmem:[%s270_s1 + $0x70] sm:$0xff]  ;;  %v28_v23 = vld [vmem:[%s270_s1 + $0x78] sm:$0xff]  ;;  %v12_v25 = vld [vmem:[%s271_s0 + $0x8] sm:$0xff] }
   0x7   :  { %v191_v24 = vpack.c.bf16 %v28_v23, %v27_v22 }
   0x9   :  { %170 = vmatpush3.bf16.msra.mxu0 %v167_v5 }
   0xa   :  { %172 = vmatprep.subr.bf16.mxu0 %v171_v8 }
   0xd   :  { %174 = vmatpush3.bf16.msra.mxu0 %v171_v8 }
   0xe   :  { %176 = vmatprep.subr.bf16.mxu0 %v175_v12 }
  0x11   :  { %178 = vmatpush3.bf16.msra.mxu0 %v175_v12 }
  0x12   :  { %180 = vmatprep.subr.bf16.mxu0 %v179_v15 }
  0x15   :  { %182 = vmatpush3.bf16.msra.mxu0 %v179_v15 }
  0x16   :  { %184 = vmatprep.subr.bf16.mxu0 %v183_v18 }
  0x19   :  { %186 = vmatpush3.bf16.msra.mxu0 %v183_v18 }
  0x1a   :  { %188 = vmatprep.subr.bf16.mxu0 %v187_v21 }
  0x1d   :  { %190 = vmatpush3.bf16.msra.mxu0 %v187_v21 }
  0x1e   :  { %192 = vmatprep.subr.bf16.mxu0 %v191_v24 }
  0x21   :  { %194 = vmatpush3.bf16.msra.mxu0 %v191_v24 }
  0x24   :  { %161 = vmatmul.mubr.f32.vlgmr.msra.gmra.mrb[0].mxu0 %v12_v25 }
  0xf7   :  { %v162_v26 = vpop.f32.mrb[0].mxu0 }
  0xf8   :  { %105 = vst [vmem:[%s272_s2 + $0x8] sm:$0xff] %v162_v26  ;;  %v95_v27 = vpop.f32.mrb[1].mxu0 }
  0xf9   :  { %104 = vst [vmem:[%s272_s2] sm:$0xff] %v95_v27 }

</bundles_post_ra>
